<compile_context>
chip_gen: v6e
topology: v6e:2x2x1
jax: 0.10.0
libtpu: 0.0.40
codegen_flags: <defaults>
</compile_context>

<pallas_src>
import jax
import jax.numpy as jnp
from jax.experimental import pallas as pl
from jax.experimental.pallas import tpu as pltpu


def _senet_kernel(x_ref, w1t_ref, w2t_ref, o_ref):
    # x_ref: (B, C, HW) block, NCHW-native (HW on the lane axis).

    # squeeze: global average pool over spatial (lane-axis reduce), f32 accum.
    inv_hw = 1.0 / x_ref.shape[2]
    pooled = jnp.sum(x_ref[...], axis=2, dtype=jnp.float32) * inv_hw   # (B, C)

    # excitation: fc1 -> relu -> fc2 -> sigmoid (tiny vs HBM traffic).
    h = jnp.dot(pooled, w1t_ref[...],
                preferred_element_type=jnp.float32)                    # (B, hid)
    h = jnp.maximum(h, 0.0)
    t = jnp.dot(h, w2t_ref[...],
                preferred_element_type=jnp.float32)                    # (B, C)
    t = jax.nn.sigmoid(t)

    # scale: re-read x_ref so the big tile is not kept live across the
    # matmuls (no spill hazard); gate broadcasts over lanes.
    o_ref[...] = x_ref[...] * t[:, :, None].astype(o_ref.dtype)        # (B,C,HW)


def _pick_batch_block(n, per_image_bytes, block_budget_bytes, min_steps=8):
    """Largest divisor B of n that (a) fits the double-buffered in+out block
    budget and (b) keeps at least ~min_steps grid steps for pipelining /
    megacore, preferring an even grid length."""
    # fit: 2 (in + out) * 2 (double-buffered) * B * per_image <= budget
    max_b_fit = max(1, block_budget_bytes // (4 * per_image_bytes))
    # keep the grid long enough to overlap DMA and feed both v7x cores
    max_b_steps = max(1, n // min(min_steps, n))
    cap = min(max_b_fit, max_b_steps)
    b = 1
    for d in range(1, n + 1):
        if n % d == 0 and d <= cap:
            b = d
    # prefer an even number of grid steps (v7x: 2 TensorCores)
    if b > 1 and (n // b) % 2 == 1 and b % 2 == 0:
        b //= 2
    return b


def senet_forward(x_nchw, w1, w2):
    """x_nchw: (N, C, H, W).  w1: (hidden, C), w2: (C, hidden) (PyTorch Linear)."""
    n, c, h, w = x_nchw.shape
    hw = h * w
    hidden = w1.shape[0]

    # NCHW-native: free reshape only, no layout transposes.
    x = x_nchw.reshape(n, c, hw)
    w1t = w1.T                                   # (C, hidden)
    w2t = w2.T                                   # (hidden, C)

    itemsize = jnp.dtype(x.dtype).itemsize
    per_image = c * hw * itemsize

    # Generation-aware VMEM budget: 128 MiB physical on v5e/v6e, 64 MiB on v7x.
    try:
        info = pltpu.get_tpu_info()
        vmem_cap = int(getattr(info, "vmem_capacity_bytes", 64 * 1024 * 1024))
    except Exception:
        vmem_cap = 64 * 1024 * 1024
    vmem_limit = min((vmem_cap * 3) // 4, 100 * 1024 * 1024)  # ~96 MiB / ~48 MiB
    block_budget = max(vmem_limit - 2 * 1024 * 1024, 4 * 1024 * 1024)

    b = _pick_batch_block(n, per_image, block_budget)

    # If even a single image over-fills the double-buffered budget, fall back
    # to single-buffered big blocks instead of failing (v7x 64 MiB guard).
    single_buffer = (4 * b * per_image) > block_budget

    def _io_spec():
        if single_buffer:
            return pl.BlockSpec((b, c, hw), lambda i: (i, 0, 0),
                                pipeline_mode=pl.Buffered(1))
        return pl.BlockSpec((b, c, hw), lambda i: (i, 0, 0))

    out = pl.pallas_call(
        _senet_kernel,
        out_shape=jax.ShapeDtypeStruct((n, c, hw), x.dtype),
        grid_spec=pltpu.PrefetchScalarGridSpec(
            num_scalar_prefetch=0,
            grid=(n // b,),
            in_specs=[
                _io_spec(),
                pl.BlockSpec((c, hidden), lambda i: (0, 0)),
                pl.BlockSpec((hidden, c), lambda i: (0, 0)),
            ],
            out_specs=_io_spec(),
        ),
        compiler_params=pltpu.CompilerParams(
            dimension_semantics=("parallel",),
            vmem_limit_bytes=vmem_limit,
        ),
    )(x, w1t, w2t)

    # free reshape back to NCHW
    return out.reshape(n, c, h, w)


def senet_reference(x_nchw, w1, w2):
    pooled = jnp.mean(x_nchw, axis=(2, 3))                    # (N, C)
    h = jnp.maximum(pooled @ w1.T, 0.0)                       # (N, hidden)
    t = jax.nn.sigmoid(h @ w2.T)                              # (N, C)
    return x_nchw * t[:, :, None, None]


if __name__ == "__main__":
    # small shapes consistent with the module: channels must be >= reduction
    N, C, H, W = 2, 32, 16, 16
    reduction = 16
    hidden = C // reduction  # 2

    key = jax.random.PRNGKey(0)
    kx, k1, k2 = jax.random.split(key, 3)

    x = jax.random.normal(kx, (N, C, H, W), dtype=jnp.float32)
    # deterministic Linear-style init (uniform, no bias), like nn.Linear defaults
    bound1 = 1.0 / (C ** 0.5)
    bound2 = 1.0 / (hidden ** 0.5)
    w1 = jax.random.uniform(k1, (hidden, C), jnp.float32, -bound1, bound1)
    w2 = jax.random.uniform(k2, (C, hidden), jnp.float32, -bound2, bound2)

    out = senet_forward(x, w1, w2)
    out = jax.block_until_ready(out)

    ref = senet_reference(x, w1, w2)
    assert out.shape == (N, C, H, W)
    assert jnp.allclose(out, ref, atol=1e-5, rtol=1e-5), "mismatch vs reference"

    print("KERNEL_OK")
</pallas_src>

<mosaic_0001>
module attributes {stable_mosaic.version = 11 : i64} {
  func.func @_senet_kernel(%arg0: i32, %arg1: memref<1x32x256xf32, #tpu.memory_space<vmem>>, %arg2: memref<32x2xf32, #tpu.memory_space<vmem>>, %arg3: memref<2x32xf32, #tpu.memory_space<vmem>>, %arg4: memref<1x32x256xf32, #tpu.memory_space<vmem>>) attributes {dimension_semantics = [#tpu.dimension_semantics<parallel>], iteration_bounds = array<i64: 2>, scalar_prefetch = 0 : i64, scratch_operands = 0 : i64, tpu.core_type = #tpu.core_type<tc>, window_params = [{transform_indices = @transform_0, window_bounds = array<i64: 1, 32, 256>}, {pipeline_mode = #tpu.pipeline_mode<synchronous>, transform_indices = @transform_1, window_bounds = array<i64: 32, 2>}, {pipeline_mode = #tpu.pipeline_mode<synchronous>, transform_indices = @transform_2, window_bounds = array<i64: 2, 32>}, {transform_indices = @transform_3, window_bounds = array<i64: 1, 32, 256>}]} {
    %c0 = arith.constant 0 : index
    %c0_0 = arith.constant 0 : index
    %c0_1 = arith.constant 0 : index
    %0 = vector.load %arg1[%c0, %c0_0, %c0_1] : memref<1x32x256xf32, #tpu.memory_space<vmem>>, vector<1x32x256xf32>
    %cst = arith.constant dense<0.000000e+00> : vector<1x32xf32>
    %1 = vector.multi_reduction <add>, %0, %cst [2] : vector<1x32x256xf32> to vector<1x32xf32>
    %cst_2 = arith.constant 3.906250e-03 : f32
    %2 = vector.broadcast %cst_2 : f32 to vector<1x32xf32>
    %3 = arith.mulf %1, %2 : vector<1x32xf32>
    %c0_3 = arith.constant 0 : index
    %c0_4 = arith.constant 0 : index
    %4 = vector.load %arg2[%c0_3, %c0_4] : memref<32x2xf32, #tpu.memory_space<vmem>>, vector<32x2xf32>
    %cst_5 = arith.constant dense<0.000000e+00> : vector<1x2xf32>
    %5 = tpu.matmul %3, %4, %cst_5 {dimension_numbers = #tpu.dot_dimension_numbers<[1], [0], [0], [1], [0, 0, 1, 1], [], []>} : vector<1x32xf32>, vector<32x2xf32>, vector<1x2xf32> -> vector<1x2xf32>
    %cst_6 = arith.constant 0.000000e+00 : f32
    %6 = vector.broadcast %cst_6 : f32 to vector<1x2xf32>
    %7 = arith.maximumf %5, %6 : vector<1x2xf32>
    %c0_7 = arith.constant 0 : index
    %c0_8 = arith.constant 0 : index
    %8 = vector.load %arg3[%c0_7, %c0_8] : memref<2x32xf32, #tpu.memory_space<vmem>>, vector<2x32xf32>
    %cst_9 = arith.constant dense<0.000000e+00> : vector<1x32xf32>
    %9 = tpu.matmul %7, %8, %cst_9 {dimension_numbers = #tpu.dot_dimension_numbers<[1], [0], [0], [1], [0, 0, 1, 1], [], []>} : vector<1x2xf32>, vector<2x32xf32>, vector<1x32xf32> -> vector<1x32xf32>
    %10 = arith.negf %9 : vector<1x32xf32>
    %11 = math.exp %10 : vector<1x32xf32>
    %cst_10 = arith.constant 1.000000e+00 : f32
    %12 = vector.broadcast %cst_10 : f32 to vector<1x32xf32>
    %13 = arith.addf %12, %11 : vector<1x32xf32>
    %14 = arith.divf %12, %13 : vector<1x32xf32>
    %c0_11 = arith.constant 0 : index
    %c0_12 = arith.constant 0 : index
    %c0_13 = arith.constant 0 : index
    %15 = vector.load %arg1[%c0_11, %c0_12, %c0_13] : memref<1x32x256xf32, #tpu.memory_space<vmem>>, vector<1x32x256xf32>
    %16 = vector.shape_cast %14 : vector<1x32xf32> to vector<1x32x1xf32>
    %17 = vector.broadcast %16 : vector<1x32x1xf32> to vector<1x32x256xf32>
    %18 = arith.mulf %15, %17 : vector<1x32x256xf32>
    %c0_14 = arith.constant 0 : index
    %c0_15 = arith.constant 0 : index
    %c0_16 = arith.constant 0 : index
    %19 = vector.load %arg4[%c0_14, %c0_15, %c0_16] : memref<1x32x256xf32, #tpu.memory_space<vmem>>, vector<1x32x256xf32>
    tpu.vector_store %arg4[%c0_14, %c0_15, %c0_16], %18 {strides = array<i32>} : memref<1x32x256xf32, #tpu.memory_space<vmem>>, vector<1x32x256xf32>,
    return
  }
  func.func @transform_0(%arg0: i32) -> (i32, i32, i32) {
    %c0_i32 = arith.constant 0 : i32
    %c0_i32_0 = arith.constant 0 : i32
    %c0_i32_1 = arith.constant 0 : i32
    return %arg0, %c0_i32, %c0_i32_0 : i32, i32, i32
  }
  func.func @transform_1(%arg0: i32) -> (i32, i32) {
    %c0_i32 = arith.constant 0 : i32
    %c0_i32_0 = arith.constant 0 : i32
    %c0_i32_1 = arith.constant 0 : i32
    return %c0_i32, %c0_i32_0 : i32, i32
  }
  func.func @transform_2(%arg0: i32) -> (i32, i32) {
    %c0_i32 = arith.constant 0 : i32
    %c0_i32_0 = arith.constant 0 : i32
    %c0_i32_1 = arith.constant 0 : i32
    return %c0_i32, %c0_i32_0 : i32, i32
  }
  func.func @transform_3(%arg0: i32) -> (i32, i32, i32) {
    %c0_i32 = arith.constant 0 : i32
    %c0_i32_0 = arith.constant 0 : i32
    %c0_i32_1 = arith.constant 0 : i32
    return %arg0, %c0_i32, %c0_i32_0 : i32, i32, i32
  }
}

</mosaic_0001>

<bundles_post_ra>
// kernel: tpu_custom_call.1
= control target key start
LH: loop header
LB: loop body
LE: loop exit
PB: predicated region body
PF: predicated region fallthrough
CT: control target
= control target key end

     0   :  { %8 = vsyncpa [#allocation3], 0  ;;  %s955_s0 = inlined_call_operand.hbm [shape: f32[2,32,256], index: 0, kind: input, shape index: {}]   ;;  %s956_s1 = inlined_call_operand.vmem [shape: f32[32,2], index: 1, kind: input, shape index: {}]   ;;  %s957_s2 = inlined_call_operand.vmem [shape: f32[2,32], index: 2, kind: input, shape index: {}]   ;;  %s958_s3 = inlined_call_operand.hbm [shape: f32[2,32,256], index: 3, kind: output, shape index: {}]  }
   0x1   :  { %10 = vsyncpa [#allocation3 + $0x1], 0 }
   0x2   :  { %11 = vsyncpa [#allocation4], 0 }
   0x3   :  { %13 = vsyncpa [#allocation4 + $0x1], 0  ;;  %s750_s12 = smov 0   ;;  %s752_s13 = smov 0  }
   0x4   :  { %s754_s14 = smov 0   ;;  %s756_s15 = smov 0  }
   0x5 LB: > { %s771_s16 = sadd.s32 4294967295, %s720_s15   ;;  %s529_s17 = sadd.s32 4294967294, %s720_s15   ;;  %s720_s15 = sphi %s756_s15, %s973_s15   ;;  %s716_s14 = sphi %s754_s14, %s972_s14   ;;  %s712_s13 = sphi %s752_s13, %s971_s13   ;;  %s708_s12 = sphi %s750_s12, %s970_s12  }
   0x6   : > { %s775_s18 = sadd.s32 1, %s720_s15   ;;  %s26_s19 = sadd.s32 1, %s716_s14 }
   0x7   : > { %s23_s20 = ssub.s32 %s720_s15, %s775_s18  ;;  %p33_p0 = scmp.ne.s32.totalorder %s716_s14, %s712_s13 }
   0x8   : > { %p24_p1 = scmp.eq.s32.totalorder %s23_s20, 0  ;;  %p34_p2 = scmp.eq.s32.totalorder %s720_s15, 0 }
   0x9   : > { %p39_p3 = scmp.ne.s32.totalorder %s712_s13, %s708_s12  ;;  %p40_p4 = scmp.eq.s32.totalorder %s771_s16, 0 }
   0xa   : > { %s787_s21 = scalar_select %p24_p1, %s716_s14, %s26_s19  }
   0xb   : > { %p789_p5 = por %p34_p2, %p33_p0  ;;  %p793_p6 = por %p40_p4, %p39_p3 }
   0xc   : > { %p105_p7 = scmp.eq.s32.totalorder %s771_s16, 1  ;;  %p111_p8 = scmp.eq.s32.totalorder %s529_s17, 1 }
   0xd   : > { %s962_s23 = scalar_select %p793_p6, 1, 0 }
   0xe   : > { %p584_p10 = scmp.lt.s32.totalorder %s720_s15, 2  ;;  %p800_p11 = por %p105_p7, %p33_p0 }
   0xf   : > { %p804_p12 = por %p111_p8, %p39_p3  ;;  %s137_s26 = sand.u32 1, %s716_s14  }
  0x10   : > { %s963_s24 = scalar_select %p800_p11, 1, 0 }
  0x11   : > { %s964_s25 = scalar_select %p804_p12, 1, 0 }
  0x12   : > { %s547_s27 = sshll.u32 %s720_s15, 10  ;;  %s532_s28 = sshll.u32 %s137_s26, 6 }
  0x13   : > { %s813_s4 = scalar_lea.hbm %s955_s0, %s547_s27  ;;  %s141_s5 = scalar_lea.vmem [#allocation2], %s532_s28 }
  0x14   : > { %s148_s6 = sshll.u32 %s141_s5, 4  ;;  %p817_p13 = pnand %p584_p10, %p789_p5  ;;  %s821_s6 = int_to_ptr.vmem [resolvable:$true] %s148_s6 }
  0x15   : > { %s823_s8 = scalar_lea.sflag [#allocation3], %s137_s26  ;;  %s628_s9 = scalar_lea.hbm %s813_s4, 1024 }
  0x16   : > { %p629_p0 = scmp.ne.s32.totalorder %s813_s4, %s628_s9  ;;  %p630_p1 = pneg %p817_p13 }
  0x17   : > { %s633_s17 = scalar_lea.hbm %s955_s0, 2048  ;;  %p634_p4 = scmp.lt.s32.totalorder %s813_s4, %s955_s0 }
  0x18   : > { %p631_p2 = pnand %p630_p1, %p629_p0  ;;  %p635_p5 = scmp.lt.s32.totalorder %s633_s17, %s628_s9 }
  0x1a   : > { %p632_p3 = pneg %p631_p2  ;;  %p636_p7 = por %p635_p5, %p634_p4 }
  0x1c   : > { %p637_p8 = pnand %p636_p7, %p632_p3 }
  0x1e   : > { %640 = shalt.err (!%p637_p8)
}
  0x1f   : > { %s641_s22 = scalar_lea.vmem %s821_s6, 1024  ;;  %s722_s26 = smov [#allocation2]  }
  0x20   : > { %p642_p10 = scmp.ne.s32.totalorder %s821_s6, %s641_s22  ;;  %s646_s27 = sshll.u32 %s722_s26, 4  ;;  %s647_s27 = int_to_ptr.vmem [resolvable:$false] %s646_s27 }
  0x21   : > { %s648_s28 = scalar_lea.vmem %s647_s27, 2048  ;;  %p649_p2 = scmp.lt.s32.totalorder %s821_s6, %s647_s27 }
  0x22   : > { %p644_p9 = pnand %p642_p10, %p630_p1  ;;  %p650_p12 = scmp.lt.s32.totalorder %s648_s28, %s641_s22 }
  0x24   : > { %p645_p0 = pneg %p644_p9  ;;  %p651_p11 = por %p650_p12, %p649_p2 }
  0x26   : > { %p652_p6 = pnand %p651_p11, %p645_p0 }
  0x28   : > { %655 = shalt.err (!%p652_p6)
}
  0x29   : > { %s723_s29 = smov 256   ;;  %s724_s30 = smov 16  }
  0x2a   : > { %579 = dma.hbm_to_vmem [thread:$0]  (!%p817_p13), %s813_s4, 1024, %s821_s6, %s823_s8, %s723_s29, %s723_s29, %s724_s30  }
  0x2b   : > { %p535_p9 = scmp.ge.s32.totalorder %s720_s15, 1  ;;  %p156_p1 = scmp.lt.s32.totalorder %s720_s15, 3 }
  0x2d   : > { %p157_p3 = pnand %p535_p9, %p156_p1 }
  0x2e   : > { %s847_s5 = sand.u32 (!%p157_p3), 1, %s712_s13   ;;  %p966_p6 = scmp.ne.s32.totalorder (!%p157_p3), %s962_s23, 0 }
  0x2f   : > { %160 = sbr.rel (%p157_p3) target bundleno = 766 (0x2fe), region = 32  ;;  %s536_s9 = sshll.u32 (!%p157_p3), %s847_s5, 6 }
  0x30   : > { %s163_s10 = scalar_lea.sflag (!%p157_p3), [#allocation3], %s847_s5  ;;  %s166_s11 = scalar_lea.vmem (!%p157_p3), [#allocation2], %s536_s9 }
  0x34   : > { %699 = dma.done.wait (%p966_p6), %s163_s10, 1024  }
  0x35   : > { %701 = vsyncadd (%p966_p6), %s163_s10, 4294966272  ;;  %v857_v0 = vld [vmem:[%s166_s11] sm:$0xff]  ;;  %v859_v1 = vld [vmem:[%s166_s11 + $0x8] sm:$0xff]  ;;  %v725_v12 = vmov 0.0   ;;  %vm726_vm0 = vmmov 0   ;;  %v221_v17 = vlaneseq  ;;  %vm232_vm1 = vcmask 130112  }
  0x36   : > { %v861_v2 = vld [vmem:[%s166_s11 + $0x20] sm:$0xff]  ;;  %v197_v3 = vadd.f32 %v859_v1, %v857_v0  ;;  %v865_v4 = vld [vmem:[%s166_s11 + $0x28] sm:$0xff]  ;;  %v867_v5 = vld [vmem:[%s166_s11 + $0x10] sm:$0xff]  ;;  %556 = vmatprep.subr.mxu0 %v725_v12  ;;  %567 = vmatprep.subr.mxu1 %v725_v12  ;;  %vm239_vm2 = vcmask 195712   ;;  %vm246_vm3 = vcmask 261312   ;;  %vm248_vm4 = vcmask 261120  }
  0x37   : > { %v869_v6 = vld [vmem:[%s166_s11 + $0x18] sm:$0xff]  ;;  %v203_v7 = vadd.f32 %v865_v4, %v861_v2  ;;  %v873_v8 = vld [vmem:[%s166_s11 + $0x30] sm:$0xff]  ;;  %v214_v15 = vld [vmem:[%s956_s1 + $0x8] sm:$0xff]  ;;  %564 = vmatprep.mubr.msk.f32.mxu0 %vm726_vm0, %v725_v12  ;;  %569 = vmatprep.mubr.msk.f32.mxu1 %vm726_vm0, %v725_v12  ;;  %v222_v18 = vand.u32 127, %v221_v17  ;;  %v224_v19 = vshrl.u32 %v221_v17, 7  ;;  %vm327_vm5 = vcmask 1041408  }
  0x38   : > { %v875_v9 = vld [vmem:[%s166_s11 + $0x38] sm:$0xff]  ;;  %198 = vadd.xlane.f32.xlu0 %v197_v3  ;;  %v200_v10 = vadd.f32 %v869_v6, %v867_v5  ;;  %v215_v14 = vld [vmem:[%s956_s1 + $0x10] sm:$0xff]  ;;  %v213_v16 = vld [vmem:[%s956_s1] sm:$0xff]  ;;  %vm323_vm6 = vcmask 15360   ;;  %s188_s27 = scalar_lea.vmem [#allocation5], %s536_s9  ;;  %s548_s29 = sshll.u32 %s771_s16, 10 }
  0x39   : > { %204 = vadd.xlane.f32.xlu1 %v203_v7  ;;  %v206_v11 = vadd.f32 %v875_v9, %v873_v8  ;;  %v216_v13 = vld [vmem:[%s956_s1 + $0x18] sm:$0xff]  ;;  %v227_v20 = vadd.s32 4294967288, %v222_v18  ;;  %v234_v22 = vadd.s32 4294967280, %v222_v18  ;;  %v241_v23 = vadd.s32 4294967272, %v222_v18  ;;  %v322_v42 = vld [vmem:[%s957_s2] sm:$0x3]  ;;  %s910_s10 = scalar_lea.hbm %s958_s3, %s548_s29 }
  0x3a   : > { %557 = vmatpush3.msra.mxu0 %v216_v13  ;;  %v225_v25 = vsub.s32 %v222_v18, %v224_v19  ;;  %568 = vmatpush3.msk.msra.mxu1 %vm327_vm5, %v322_v42  ;;  %v409_v51 = vsub.s32 0, %v224_v19  ;;  %s456_s28 = sshll.u32 %s188_s27, 4  ;;  %s443_s16 = scalar_lea.sflag [#allocation4], %s847_s5  ;;  %s905_s28 = int_to_ptr.vmem [resolvable:$true] %s456_s28 }
  0x3b   : > { %558 = vmatprep.subr.mxu0 %v725_v12  ;;  %v230_v27 = vsub.s32 %v227_v20, %v224_v19  ;;  %v237_v28 = vsub.s32 %v234_v22, %v224_v19  ;;  %v244_v31 = vsub.s32 %v241_v23, %v224_v19  ;;  %s656_s11 = scalar_lea.vmem %s905_s28, 1024  ;;  %p967_p12 = scmp.ne.s32.totalorder %s963_s24, 0 }
  0x3c   : > { %201 = vadd.xlane.f32.xlu0 %v200_v10  ;;  %559 = vmatpush3.msra.mxu0 %v215_v14  ;;  %p657_p11 = scmp.ne.s32.totalorder %s905_s28, %s656_s11  ;;  %s727_s23 = smov [#allocation5]  }
  0x3d   : > { %207 = vadd.xlane.f32.xlu1 %v206_v11  ;;  %560 = vmatprep.subr.mxu0 %v725_v12  ;;  %s660_s4 = sshll.u32 %s727_s23, 4  ;;  %s661_s4 = int_to_ptr.vmem [resolvable:$false] %s660_s4 }
  0x3e   : > { %561 = vmatpush3.msra.mxu0 %v214_v15  ;;  %p658_p13 = pnand %p657_p11, %p967_p12  ;;  %s662_s6 = scalar_lea.vmem %s661_s4, 2048 }
  0x3f   : > { %562 = vmatprep.subr.mxu0 %v725_v12  ;;  %p663_p5 = scmp.lt.s32.totalorder %s905_s28, %s661_s4  ;;  %p664_p7 = scmp.lt.s32.totalorder %s662_s6, %s656_s11 }
  0x40   : > { %563 = vmatpush3.msra.mxu0 %v213_v16  ;;  %p659_p4 = pneg %p658_p13 }
  0x41   : > { %p665_p8 = por %p664_p7, %p663_p5 }
  0x43   : > { %p666_p10 = pnand %p665_p8, %p659_p4 }
  0xc1   : > { %v199_v21 = vpop.xlane.xlu0 %198 }
  0xc2   : > { %v205_v24 = vpop.xlane.xlu1 %204  ;;  %v209_v26 = vmul.f32 0.00390625, %v199_v21 }
  0xc3   : > { %v211_v29 = vmul.f32 0.00390625, %v205_v24 }
  0xc4   : > { %v226_v35 = vrot.slane %v209_v26, %v225_v25 }
  0xc5   : > { %v202_v30 = vpop.xlane.xlu0 %201  ;;  %v238_v37 = vrot.slane %v211_v29, %v237_v28 }
  0xc6   : > { %v210_v32 = vmul.f32 0.00390625, %v202_v30  ;;  %v208_v33 = vpop.xlane.xlu1 %207 }
  0xc7   : > { %v212_v34 = vmul.f32 0.00390625, %v208_v33 }
  0xc8   : > { %v231_v36 = vrot.slane %v210_v32, %v230_v27 }
  0xc9   : > { %v245_v38 = vrot.slane %v212_v34, %v244_v31 }
  0xca   : > { %v233_v39 = vsel %vm232_vm1, %v231_v36, %v226_v35 }
  0xcb   : > { %v240_v40 = vsel %vm239_vm2, %v238_v37, %v233_v39 }
  0xcc   : > { %v247_v41 = vsel %vm246_vm3, %v245_v38, %v240_v40 }
  0xcd   : > { %565 = vmatmul.mubr.msk.f32.vlgmr.msra.gmra.mxu0 %vm248_vm4, %v247_v41 }
 0x18d   : > { %v317_v43 = vpop.f32.mrf.mxu0 }
 0x18e   : > { %v321_v44 = vmax.f32 %v317_v43, 0.0 }
 0x18f   : > { %v566_v45 = vpop.f32.mrf.mxu0 }
 0x190   : > { %570 = vmatmul.mubr.msk.f32.vlgmr.msra.gmra.mxu1 %vm323_vm6, %v321_v44 }
 0x250   : > { %v397_v46 = vpop.f32.mrf.mxu1 }
 0x251   : > { %v541_v47 = vmul.f32 -1.442695, %v397_v46 }
 0x252   : > { %v571_v48 = vpop.f32.mrf.mxu1 }
 0x253   : > { %624 = vpow2.f32 %v541_v47 }
 0x260   : > { %v625_v49 = vpop.eup %624 }
 0x261   : > { %v404_v50 = vadd.f32 1.0, %v625_v49 }
 0x263   : > { %626 = vrcp.f32 %v404_v50 }
 0x270   : > { %v627_v52 = vpop.eup %626 }
 0x271   : > { %v410_v53 = vrot.slane %v627_v52, %v409_v51 }
 0x273   : > { %416 = vbcast.lane.b32.xlu1 %v410_v53, 264  ;;  %412 = vbcast.lane.b32.xlu0 %v410_v53, 256 }
 0x277   : > { %420 = vbcast.lane.b32.xlu1 %v410_v53, 272 }
 0x27b   : > { %424 = vbcast.lane.b32.xlu1 %v410_v53, 280 }
 0x2e5   : > { %v417_v54 = vpop.permute.xlu1 %416  ;;  %v413_v55 = vpop.permute.xlu0 %412 }
 0x2e6   : > { %v428_v56 = vmul.f32 %v417_v54, %v867_v5  ;;  %v429_v57 = vmul.f32 %v417_v54, %v869_v6  ;;  %v426_v58 = vmul.f32 %v413_v55, %v857_v0  ;;  %v427_v59 = vmul.f32 %v413_v55, %v859_v1 }
 0x2e8   : > { %436 = vst [vmem:[%s188_s27 + $0x10] sm:$0xff] %v428_v56  ;;  %437 = vst [vmem:[%s188_s27 + $0x18] sm:$0xff] %v429_v57 }
 0x2e9   : > { %434 = vst [vmem:[%s188_s27] sm:$0xff] %v426_v58  ;;  %435 = vst [vmem:[%s188_s27 + $0x8] sm:$0xff] %v427_v59  ;;  %v421_v60 = vpop.permute.xlu1 %420 }
 0x2ea   : > { %v430_v61 = vmul.f32 %v421_v60, %v861_v2  ;;  %v431_v62 = vmul.f32 %v421_v60, %v865_v4 }
 0x2ec   : > { %438 = vst [vmem:[%s188_s27 + $0x20] sm:$0xff] %v430_v61  ;;  %439 = vst [vmem:[%s188_s27 + $0x28] sm:$0xff] %v431_v62 }
 0x2ed   : > { %v425_v63 = vpop.permute.xlu1 %424 }
 0x2ee   : > { %v432_v0 = vmul.f32 %v425_v63, %v873_v8  ;;  %v433_v1 = vmul.f32 %v425_v63, %v875_v9 }
 0x2f0   : > { %440 = vst [vmem:[%s188_s27 + $0x30] sm:$0xff] %v432_v0  ;;  %441 = vst [vmem:[%s188_s27 + $0x38] sm:$0xff] %v433_v1 }
 0x2f1   : > { %669 = shalt.err (!%p666_p10)
}
 0x2f2   : > { %s670_s7 = scalar_lea.hbm %s910_s10, 1024  ;;  %s674_s19 = scalar_lea.hbm %s958_s3, 2048 }
 0x2f3   : > { %p671_p0 = scmp.ne.s32.totalorder %s910_s10, %s670_s7  ;;  %p675_p1 = scmp.lt.s32.totalorder %s910_s10, %s958_s3 }
 0x2f4   : > { %p676_p3 = scmp.lt.s32.totalorder %s674_s19, %s670_s7 }
 0x2f5   : > { %p672_p2 = pnand %p671_p0, %p967_p12 }
 0x2f6   : > { %p677_p6 = por %p676_p3, %p675_p1 }
 0x2f7   : > { %p673_p9 = pneg %p672_p2 }
 0x2f9   : > { %p678_p11 = pnand %p677_p6, %p673_p9 }
 0x2fb   : > { %681 = shalt.err (!%p678_p11)
}
 0x2fc   : > { %s728_s26 = smov 256   ;;  %s729_s27 = smov 16  }
 0x2fd   : > { %574 = dma.vmem_to_hbm [thread:$0]  (%p967_p12), %s905_s28, 1024, %s910_s10, %s443_s16, %s728_s26, %s728_s26, %s729_s27  }
 0x2fe PF: > { %s471_s29 = sand.u32 1, %s708_s12   ;;  %p968_p13 = scmp.ne.s32.totalorder %s964_s25, 0 }
 0x2ff   : > { %p969_p4 = scmp.ge.s32.totalorder %s720_s15, 2  ;;  %s472_s30 = scalar_lea.sflag [#allocation4], %s471_s29 }
 0x301   : > { %p581_p5 = pnand %p969_p4, %p968_p13 }
 0x303   : > { %p582_p7 = pneg %p581_p5 }
 0x305   : > { %703 = dma.done.wait (%p582_p7), %s472_s30, 1024  }
 0x306   : > { %705 = vsyncadd (%p582_p7), %s472_s30, 4294966272  ;;  %p16_p8 = scmp.ge.s32.totalorder %s775_s18, 4   ;;  %s970_s12 = smov %s712_s13 }
 0x307   : > { %s971_s13 = smov %s716_s14  ;;  %s972_s14 = smov %s787_s21 }
 0x308   : > { %s973_s15 = smov %s775_s18  ;;  %18 = sbr.rel (!%p16_p8) target bundleno = 5 (0x5), region = 77 }
 0x30d   :  { %477 = vsyncpa [#allocation3], 1 }
 0x30e   :  { %479 = vsyncpa [#allocation3 + $0x1], 1 }
 0x30f   :  { %480 = vsyncpa [#allocation4], 1 }
 0x310   :  { %482 = vsyncpa [#allocation4 + $0x1], 1 }

</bundles_post_ra>
